<compile_context>
chip_gen: v7x
topology: tpu7x:2x2x1
jax: 0.10.0
libtpu: 0.0.40
codegen_flags: <defaults>
</compile_context>

<pallas_src>
import functools

import jax
import jax.numpy as jnp
from jax.experimental import pallas as pl
from jax.experimental.pallas import tpu as pltpu


def _stem_kernel(a_ref, b_ref, w_ref, bias_ref, o_ref, patch_ref,
                 *, tho, wo, cin, cout):
    """Fused 3x3/s2 conv (in-kernel im2col -> one MXU matmul) + folded-BN bias + HardSwish.

    a_ref    : (4, tho, Wh, cin)   bf16  parity planes for output rows [r0, r0+tho)
    b_ref    : (4, 1,   Wh, cin)   bf16  halo row r0+tho (used only by the kh==2 taps)
    w_ref    : (9*cin, cout)       bf16  HWIO-flattened weights with BN scale folded in
    bias_ref : (1, cout)           f32   folded BN bias
    o_ref    : (1, tho*wo, cout)   f32   flattened (row, col) output pixels
    patch_ref: (tho, wo, 9*cin)    bf16  VMEM scratch: im2col patches for this tile
    """
    # ---- assemble the im2col patch buffer for this row-tile ----
    for kh in range(3):
        rp, dh = kh % 2, kh // 2          # row parity / extra-row offset
        for kw in range(3):
            cp, dw = kw % 2, kw // 2      # col parity / extra-col offset
            p = 2 * rp + cp               # which parity plane
            if dh == 0:
                rows = a_ref[p]                                    # (tho, Wh, cin)
            elif tho == 1:
                rows = b_ref[p]                                    # (1, Wh, cin)
            else:
                rows = jnp.concatenate(
                    [a_ref[p, pl.ds(1, tho - 1)], b_ref[p]], axis=0)
            k = 3 * kh + kw               # matches the flattened weight layout
            patch_ref[:, :, k * cin:(k + 1) * cin] = rows[:, dw:dw + wo, :]

    # f32 detour makes the (tho, wo, 9c) -> (tho*wo, 9c) collapse a tile-aligned no-op;
    # the cast back to bf16 is lossless (values originated as bf16).
    patches = patch_ref[...].astype(jnp.float32)
    patches = patches.reshape(tho * wo, 9 * cin).astype(jnp.bfloat16)

    acc = jnp.dot(patches, w_ref[...], preferred_element_type=jnp.float32)
    y = acc + bias_ref[...]                                        # folded BN bias
    y = y * jnp.clip(y + 3.0, 0.0, 6.0) * (1.0 / 6.0)              # HardSwish
    o_ref[0] = y.astype(o_ref.dtype)


def mobilenet_stem(x_nchw, w_oihw, gamma, beta, run_mean, run_var,
                   eps=1e-5, max_tile_ho=32):
    N, Cin, H, W = x_nchw.shape
    Cout, _, KH, KW = w_oihw.shape
    assert (KH, KW) == (3, 3)
    assert H % 2 == 0 and W % 2 == 0, "stride-2 stem expects even spatial dims"
    Ho, Wo = H // 2, W // 2
    Hh, Wh = Ho + 1, Wo + 1                       # parity-plane spatial extents

    # Largest H-tile <= max_tile_ho that divides Ho (amortizes per-step overhead).
    tho = 1
    for t in range(1, min(max_tile_ho, Ho) + 1):
        if Ho % t == 0:
            tho = t
    grid = (N, Ho // tho)

    # ---- glue: NCHW -> NHWC (bf16), zero-pad, split into 4 stride-2 parity planes ----
    x = jnp.transpose(x_nchw, (0, 2, 3, 1)).astype(jnp.bfloat16)   # (N, H, W, Cin)
    xp = jnp.pad(x, ((0, 0), (1, 1), (1, 1), (0, 0)))              # (N, H+2, W+2, Cin)
    xpar = jnp.stack([xp[:, 0::2, 0::2], xp[:, 0::2, 1::2],
                      xp[:, 1::2, 0::2], xp[:, 1::2, 1::2]], axis=1)
    xpar = xpar.reshape(N * 4, Hh, Wh, Cin)                        # row = n*4 + parity
    # TODO(synk): fold the zero-pad + parity split into the kernel's own DMA to save
    # this one extra pass over the activations.

    # ---- fold inference BatchNorm into the conv weight / bias ----
    scale = gamma / jnp.sqrt(run_var + eps)                        # (Cout,)
    bias = (beta - run_mean * scale).reshape(1, Cout).astype(jnp.float32)
    w_hwio = jnp.transpose(w_oihw, (2, 3, 1, 0)) * scale           # (3,3,Cin,Cout)
    w_flat = w_hwio.reshape(KH * KW * Cin, Cout).astype(jnp.bfloat16)

    kernel = functools.partial(_stem_kernel, tho=tho, wo=Wo, cin=Cin, cout=Cout)

    out_flat = pl.pallas_call(
        kernel,
        out_shape=jax.ShapeDtypeStruct((N, Ho * Wo, Cout), jnp.float32),
        grid=grid,
        in_specs=[
            # main strip: 4 parity planes of image n, rows [tho*i, tho*(i+1))
            pl.BlockSpec((4, tho, Wh, Cin), lambda n, i: (n, i, 0, 0)),
            # halo: the single extra row tho*(i+1) (always in-bounds: <= Ho < Hh)
            pl.BlockSpec((4, 1, Wh, Cin), lambda n, i: (n, tho * (i + 1), 0, 0)),
            # weight / bias: resident, same block for every grid step
            pl.BlockSpec((KH * KW * Cin, Cout), lambda n, i: (0, 0)),
            pl.BlockSpec((1, Cout), lambda n, i: (0, 0)),
        ],
        out_specs=pl.BlockSpec((1, tho * Wo, Cout), lambda n, i: (n, i, 0)),
        scratch_shapes=[pltpu.VMEM((tho, Wo, KH * KW * Cin), jnp.bfloat16)],
        compiler_params=pltpu.CompilerParams(
            dimension_semantics=("parallel", "parallel")),
    )(xpar, xpar, w_flat, bias)

    # back to NCHW to match the PyTorch output convention
    out_nhwc = out_flat.reshape(N, Ho, Wo, Cout)
    return jnp.transpose(out_nhwc, (0, 3, 1, 2)).astype(x_nchw.dtype)


def reference(x_nchw, w_oihw, gamma, beta, run_mean, run_var, eps=1e-5):
    y = jax.lax.conv_general_dilated(
        x_nchw, w_oihw, window_strides=(2, 2), padding=((1, 1), (1, 1)),
        dimension_numbers=("NCHW", "OIHW", "NCHW"))
    s = (gamma / jnp.sqrt(run_var + eps)).reshape(1, -1, 1, 1)
    b = (beta - run_mean * gamma / jnp.sqrt(run_var + eps)).reshape(1, -1, 1, 1)
    y = y * s + b
    return y * jnp.clip(y + 3.0, 0.0, 6.0) / 6.0


if __name__ == "__main__":
    key = jax.random.PRNGKey(0)
    k_x, k_w, k_g, k_b, k_m, k_v = jax.random.split(key, 6)

    N, Cin, H, W = 2, 4, 16, 16
    Cout = 16

    x = jax.random.normal(k_x, (N, Cin, H, W), dtype=jnp.float32)
    w = 0.1 * jax.random.normal(k_w, (Cout, Cin, 3, 3), dtype=jnp.float32)
    gamma = 1.0 + 0.1 * jax.random.normal(k_g, (Cout,), dtype=jnp.float32)
    beta = 0.05 * jax.random.normal(k_b, (Cout,), dtype=jnp.float32)
    run_mean = 0.1 * jax.random.normal(k_m, (Cout,), dtype=jnp.float32)
    run_var = jnp.abs(1.0 + 0.1 * jax.random.normal(k_v, (Cout,), dtype=jnp.float32))

    # max_tile_ho=4 -> tho=4, grid=(2, 2): exercises multi-step pipelining + halo fetch.
    stem = jax.jit(functools.partial(mobilenet_stem, max_tile_ho=4))
    out = jax.block_until_ready(stem(x, w, gamma, beta, run_mean, run_var))

    ref = reference(x, w, gamma, beta, run_mean, run_var)
    assert out.shape == (N, Cout, H // 2, W // 2), out.shape
    err = float(jnp.max(jnp.abs(out - ref)))
    # bf16 conv inputs/weights vs. the f32 reference -> relaxed tolerance
    assert err < 5e-2, err

    print("KERNEL_OK")
</pallas_src>

<mosaic_0001>
module attributes {stable_mosaic.version = 11 : i64} {
  func.func @_stem_kernel(%arg0: i32, %arg1: i32, %arg2: memref<4x4x9x4xbf16, #tpu.memory_space<vmem>>, %arg3: memref<4x1x9x4xbf16, #tpu.memory_space<vmem>>, %arg4: memref<36x16xbf16, #tpu.memory_space<vmem>>, %arg5: memref<1x16xf32, #tpu.memory_space<vmem>>, %arg6: memref<1x32x16xf32, #tpu.memory_space<vmem>>, %arg7: memref<4x8x36xbf16, #tpu.memory_space<vmem>>) attributes {dimension_semantics = [#tpu.dimension_semantics<parallel>, #tpu.dimension_semantics<parallel>], iteration_bounds = array<i64: 2, 2>, scalar_prefetch = 0 : i64, scratch_operands = 1 : i64, tpu.core_type = #tpu.core_type<tc>, window_params = [{transform_indices = @transform_0, window_bounds = array<i64: 4, 4, 9, 4>}, {transform_indices = @transform_1, window_bounds = array<i64: 4, 1, 9, 4>}, {pipeline_mode = #tpu.pipeline_mode<synchronous>, transform_indices = @transform_2, window_bounds = array<i64: 36, 16>}, {pipeline_mode = #tpu.pipeline_mode<synchronous>, transform_indices = @transform_3, window_bounds = array<i64: 1, 16>}, {transform_indices = @transform_4, window_bounds = array<i64: 1, 32, 16>}]} {
    %c0 = arith.constant 0 : index
    %c0_0 = arith.constant 0 : index
    %c0_1 = arith.constant 0 : index
    %c0_2 = arith.constant 0 : index
    %0 = vector.load %arg2[%c0, %c0_0, %c0_1, %c0_2] : memref<4x4x9x4xbf16, #tpu.memory_space<vmem>>, vector<1x4x9x4xbf16>
    %1 = vector.shape_cast %0 : vector<1x4x9x4xbf16> to vector<4x9x4xbf16>
    %2 = vector.extract_strided_slice %1 {offsets = [0, 0, 0], sizes = [4, 8, 4], strides = [1, 1, 1]} : vector<4x9x4xbf16> to vector<4x8x4xbf16>
    %c0_3 = arith.constant 0 : index
    %c0_4 = arith.constant 0 : index
    %c0_5 = arith.constant 0 : index
    %3 = vector.load %arg7[%c0_3, %c0_4, %c0_5] : memref<4x8x36xbf16, #tpu.memory_space<vmem>>, vector<4x8x4xbf16>
    tpu.vector_store %arg7[%c0_3, %c0_4, %c0_5], %2 {strides = array<i32>} : memref<4x8x36xbf16, #tpu.memory_space<vmem>>, vector<4x8x4xbf16>,
    %c1 = arith.constant 1 : index
    %c0_6 = arith.constant 0 : index
    %c0_7 = arith.constant 0 : index
    %c0_8 = arith.constant 0 : index
    %4 = vector.load %arg2[%c1, %c0_6, %c0_7, %c0_8] : memref<4x4x9x4xbf16, #tpu.memory_space<vmem>>, vector<1x4x9x4xbf16>
    %5 = vector.shape_cast %4 : vector<1x4x9x4xbf16> to vector<4x9x4xbf16>
    %6 = vector.extract_strided_slice %5 {offsets = [0, 0, 0], sizes = [4, 8, 4], strides = [1, 1, 1]} : vector<4x9x4xbf16> to vector<4x8x4xbf16>
    %c0_9 = arith.constant 0 : index
    %c0_10 = arith.constant 0 : index
    %c4 = arith.constant 4 : index
    %7 = vector.load %arg7[%c0_9, %c0_10, %c4] : memref<4x8x36xbf16, #tpu.memory_space<vmem>>, vector<4x8x4xbf16>
    tpu.vector_store %arg7[%c0_9, %c0_10, %c4], %6 {strides = array<i32>} : memref<4x8x36xbf16, #tpu.memory_space<vmem>>, vector<4x8x4xbf16>,
    %c0_11 = arith.constant 0 : index
    %c0_12 = arith.constant 0 : index
    %c0_13 = arith.constant 0 : index
    %c0_14 = arith.constant 0 : index
    %8 = vector.load %arg2[%c0_11, %c0_12, %c0_13, %c0_14] : memref<4x4x9x4xbf16, #tpu.memory_space<vmem>>, vector<1x4x9x4xbf16>
    %9 = vector.shape_cast %8 : vector<1x4x9x4xbf16> to vector<4x9x4xbf16>
    %10 = vector.extract_strided_slice %9 {offsets = [0, 1, 0], sizes = [4, 8, 4], strides = [1, 1, 1]} : vector<4x9x4xbf16> to vector<4x8x4xbf16>
    %c0_15 = arith.constant 0 : index
    %c0_16 = arith.constant 0 : index
    %c8 = arith.constant 8 : index
    %11 = vector.load %arg7[%c0_15, %c0_16, %c8] : memref<4x8x36xbf16, #tpu.memory_space<vmem>>, vector<4x8x4xbf16>
    tpu.vector_store %arg7[%c0_15, %c0_16, %c8], %10 {strides = array<i32>} : memref<4x8x36xbf16, #tpu.memory_space<vmem>>, vector<4x8x4xbf16>,
    %c2 = arith.constant 2 : index
    %c0_17 = arith.constant 0 : index
    %c0_18 = arith.constant 0 : index
    %c0_19 = arith.constant 0 : index
    %12 = vector.load %arg2[%c2, %c0_17, %c0_18, %c0_19] : memref<4x4x9x4xbf16, #tpu.memory_space<vmem>>, vector<1x4x9x4xbf16>
    %13 = vector.shape_cast %12 : vector<1x4x9x4xbf16> to vector<4x9x4xbf16>
    %14 = vector.extract_strided_slice %13 {offsets = [0, 0, 0], sizes = [4, 8, 4], strides = [1, 1, 1]} : vector<4x9x4xbf16> to vector<4x8x4xbf16>
    %c0_20 = arith.constant 0 : index
    %c0_21 = arith.constant 0 : index
    %c12 = arith.constant 12 : index
    %15 = vector.load %arg7[%c0_20, %c0_21, %c12] : memref<4x8x36xbf16, #tpu.memory_space<vmem>>, vector<4x8x4xbf16>
    tpu.vector_store %arg7[%c0_20, %c0_21, %c12], %14 {strides = array<i32>} : memref<4x8x36xbf16, #tpu.memory_space<vmem>>, vector<4x8x4xbf16>,
    %c3 = arith.constant 3 : index
    %c0_22 = arith.constant 0 : index
    %c0_23 = arith.constant 0 : index
    %c0_24 = arith.constant 0 : index
    %16 = vector.load %arg2[%c3, %c0_22, %c0_23, %c0_24] : memref<4x4x9x4xbf16, #tpu.memory_space<vmem>>, vector<1x4x9x4xbf16>
    %17 = vector.shape_cast %16 : vector<1x4x9x4xbf16> to vector<4x9x4xbf16>
    %18 = vector.extract_strided_slice %17 {offsets = [0, 0, 0], sizes = [4, 8, 4], strides = [1, 1, 1]} : vector<4x9x4xbf16> to vector<4x8x4xbf16>
    %c0_25 = arith.constant 0 : index
    %c0_26 = arith.constant 0 : index
    %c16 = arith.constant 16 : index
    %19 = vector.load %arg7[%c0_25, %c0_26, %c16] : memref<4x8x36xbf16, #tpu.memory_space<vmem>>, vector<4x8x4xbf16>
    tpu.vector_store %arg7[%c0_25, %c0_26, %c16], %18 {strides = array<i32>} : memref<4x8x36xbf16, #tpu.memory_space<vmem>>, vector<4x8x4xbf16>,
    %c2_27 = arith.constant 2 : index
    %c0_28 = arith.constant 0 : index
    %c0_29 = arith.constant 0 : index
    %c0_30 = arith.constant 0 : index
    %20 = vector.load %arg2[%c2_27, %c0_28, %c0_29, %c0_30] : memref<4x4x9x4xbf16, #tpu.memory_space<vmem>>, vector<1x4x9x4xbf16>
    %21 = vector.shape_cast %20 : vector<1x4x9x4xbf16> to vector<4x9x4xbf16>
    %22 = vector.extract_strided_slice %21 {offsets = [0, 1, 0], sizes = [4, 8, 4], strides = [1, 1, 1]} : vector<4x9x4xbf16> to vector<4x8x4xbf16>
    %c0_31 = arith.constant 0 : index
    %c0_32 = arith.constant 0 : index
    %c20 = arith.constant 20 : index
    %23 = vector.load %arg7[%c0_31, %c0_32, %c20] : memref<4x8x36xbf16, #tpu.memory_space<vmem>>, vector<4x8x4xbf16>
    tpu.vector_store %arg7[%c0_31, %c0_32, %c20], %22 {strides = array<i32>} : memref<4x8x36xbf16, #tpu.memory_space<vmem>>, vector<4x8x4xbf16>,
    %c0_33 = arith.constant 0 : index
    %c1_34 = arith.constant 1 : index
    %c0_35 = arith.constant 0 : index
    %c0_36 = arith.constant 0 : index
    %24 = vector.load %arg2[%c0_33, %c1_34, %c0_35, %c0_36] : memref<4x4x9x4xbf16, #tpu.memory_space<vmem>>, vector<1x3x9x4xbf16>
    %25 = vector.shape_cast %24 : vector<1x3x9x4xbf16> to vector<3x9x4xbf16>
    %c0_37 = arith.constant 0 : index
    %c0_38 = arith.constant 0 : index
    %c0_39 = arith.constant 0 : index
    %c0_40 = arith.constant 0 : index
    %26 = vector.load %arg3[%c0_37, %c0_38, %c0_39, %c0_40] : memref<4x1x9x4xbf16, #tpu.memory_space<vmem>>, vector<1x1x9x4xbf16>
    %27 = vector.shape_cast %26 : vector<1x1x9x4xbf16> to vector<1x9x4xbf16>
    %28 = tpu.concatenate %25, %27 in 0 : vector<3x9x4xbf16>, vector<1x9x4xbf16> -> vector<4x9x4xbf16>
    %29 = vector.extract_strided_slice %28 {offsets = [0, 0, 0], sizes = [4, 8, 4], strides = [1, 1, 1]} : vector<4x9x4xbf16> to vector<4x8x4xbf16>
    %c0_41 = arith.constant 0 : index
    %c0_42 = arith.constant 0 : index
    %c24 = arith.constant 24 : index
    %30 = vector.load %arg7[%c0_41, %c0_42, %c24] : memref<4x8x36xbf16, #tpu.memory_space<vmem>>, vector<4x8x4xbf16>
    tpu.vector_store %arg7[%c0_41, %c0_42, %c24], %29 {strides = array<i32>} : memref<4x8x36xbf16, #tpu.memory_space<vmem>>, vector<4x8x4xbf16>,
    %c1_43 = arith.constant 1 : index
    %c1_44 = arith.constant 1 : index
    %c0_45 = arith.constant 0 : index
    %c0_46 = arith.constant 0 : index
    %31 = vector.load %arg2[%c1_43, %c1_44, %c0_45, %c0_46] : memref<4x4x9x4xbf16, #tpu.memory_space<vmem>>, vector<1x3x9x4xbf16>
    %32 = vector.shape_cast %31 : vector<1x3x9x4xbf16> to vector<3x9x4xbf16>
    %c1_47 = arith.constant 1 : index
    %c0_48 = arith.constant 0 : index
    %c0_49 = arith.constant 0 : index
    %c0_50 = arith.constant 0 : index
    %33 = vector.load %arg3[%c1_47, %c0_48, %c0_49, %c0_50] : memref<4x1x9x4xbf16, #tpu.memory_space<vmem>>, vector<1x1x9x4xbf16>
    %34 = vector.shape_cast %33 : vector<1x1x9x4xbf16> to vector<1x9x4xbf16>
    %35 = tpu.concatenate %32, %34 in 0 : vector<3x9x4xbf16>, vector<1x9x4xbf16> -> vector<4x9x4xbf16>
    %36 = vector.extract_strided_slice %35 {offsets = [0, 0, 0], sizes = [4, 8, 4], strides = [1, 1, 1]} : vector<4x9x4xbf16> to vector<4x8x4xbf16>
    %c0_51 = arith.constant 0 : index
    %c0_52 = arith.constant 0 : index
    %c28 = arith.constant 28 : index
    %37 = vector.load %arg7[%c0_51, %c0_52, %c28] : memref<4x8x36xbf16, #tpu.memory_space<vmem>>, vector<4x8x4xbf16>
    tpu.vector_store %arg7[%c0_51, %c0_52, %c28], %36 {strides = array<i32>} : memref<4x8x36xbf16, #tpu.memory_space<vmem>>, vector<4x8x4xbf16>,
    %c0_53 = arith.constant 0 : index
    %c1_54 = arith.constant 1 : index
    %c0_55 = arith.constant 0 : index
    %c0_56 = arith.constant 0 : index
    %38 = vector.load %arg2[%c0_53, %c1_54, %c0_55, %c0_56] : memref<4x4x9x4xbf16, #tpu.memory_space<vmem>>, vector<1x3x9x4xbf16>
    %39 = vector.shape_cast %38 : vector<1x3x9x4xbf16> to vector<3x9x4xbf16>
    %c0_57 = arith.constant 0 : index
    %c0_58 = arith.constant 0 : index
    %c0_59 = arith.constant 0 : index
    %c0_60 = arith.constant 0 : index
    %40 = vector.load %arg3[%c0_57, %c0_58, %c0_59, %c0_60] : memref<4x1x9x4xbf16, #tpu.memory_space<vmem>>, vector<1x1x9x4xbf16>
    %41 = vector.shape_cast %40 : vector<1x1x9x4xbf16> to vector<1x9x4xbf16>
    %42 = tpu.concatenate %39, %41 in 0 : vector<3x9x4xbf16>, vector<1x9x4xbf16> -> vector<4x9x4xbf16>
    %43 = vector.extract_strided_slice %42 {offsets = [0, 1, 0], sizes = [4, 8, 4], strides = [1, 1, 1]} : vector<4x9x4xbf16> to vector<4x8x4xbf16>
    %c0_61 = arith.constant 0 : index
    %c0_62 = arith.constant 0 : index
    %c32 = arith.constant 32 : index
    %44 = vector.load %arg7[%c0_61, %c0_62, %c32] : memref<4x8x36xbf16, #tpu.memory_space<vmem>>, vector<4x8x4xbf16>
    tpu.vector_store %arg7[%c0_61, %c0_62, %c32], %43 {strides = array<i32>} : memref<4x8x36xbf16, #tpu.memory_space<vmem>>, vector<4x8x4xbf16>,
    %c0_63 = arith.constant 0 : index
    %c0_64 = arith.constant 0 : index
    %c0_65 = arith.constant 0 : index
    %45 = vector.load %arg7[%c0_63, %c0_64, %c0_65] : memref<4x8x36xbf16, #tpu.memory_space<vmem>>, vector<4x8x36xbf16>
    %46 = arith.extf %45 : vector<4x8x36xbf16> to vector<4x8x36xf32>
    %47 = vector.shape_cast %46 : vector<4x8x36xf32> to vector<32x36xf32>
    %48 = arith.truncf %47 : vector<32x36xf32> to vector<32x36xbf16>
    %c0_66 = arith.constant 0 : index
    %c0_67 = arith.constant 0 : index
    %49 = vector.load %arg4[%c0_66, %c0_67] : memref<36x16xbf16, #tpu.memory_space<vmem>>, vector<36x16xbf16>
    %cst = arith.constant dense<0.000000e+00> : vector<32x16xf32>
    %50 = tpu.matmul %48, %49, %cst {dimension_numbers = #tpu.dot_dimension_numbers<[1], [0], [0], [1], [0, 0, 1, 1], [], []>} : vector<32x36xbf16>, vector<36x16xbf16>, vector<32x16xf32> -> vector<32x16xf32>
    %c0_68 = arith.constant 0 : index
    %c0_69 = arith.constant 0 : index
    %51 = vector.load %arg5[%c0_68, %c0_69] : memref<1x16xf32, #tpu.memory_space<vmem>>, vector<1x16xf32>
    %52 = vector.broadcast %51 : vector<1x16xf32> to vector<32x16xf32>
    %53 = arith.addf %50, %52 : vector<32x16xf32>
    %cst_70 = arith.constant 3.000000e+00 : f32
    %54 = vector.broadcast %cst_70 : f32 to vector<32x16xf32>
    %55 = arith.addf %53, %54 : vector<32x16xf32>
    %cst_71 = arith.constant 0.000000e+00 : f32
    %cst_72 = arith.constant 6.000000e+00 : f32
    %56 = vector.broadcast %cst_71 : f32 to vector<32x16xf32>
    %57 = arith.maximumf %56, %55 : vector<32x16xf32>
    %58 = vector.broadcast %cst_72 : f32 to vector<32x16xf32>
    %59 = arith.minimumf %58, %57 : vector<32x16xf32>
    %60 = arith.mulf %53, %59 : vector<32x16xf32>
    %cst_73 = arith.constant 0.166666672 : f32
    %61 = vector.broadcast %cst_73 : f32 to vector<32x16xf32>
    %62 = arith.mulf %60, %61 : vector<32x16xf32>
    %c0_74 = arith.constant 0 : index
    %c0_75 = arith.constant 0 : index
    %c0_76 = arith.constant 0 : index
    %63 = vector.load %arg6[%c0_74, %c0_75, %c0_76] : memref<1x32x16xf32, #tpu.memory_space<vmem>>, vector<1x32x16xf32>
    %64 = vector.shape_cast %63 : vector<1x32x16xf32> to vector<32x16xf32>
    %65 = vector.shape_cast %62 : vector<32x16xf32> to vector<1x32x16xf32>
    tpu.vector_store %arg6[%c0_74, %c0_75, %c0_76], %65 {strides = array<i32>} : memref<1x32x16xf32, #tpu.memory_space<vmem>>, vector<1x32x16xf32>,
    return
  }
  func.func @transform_0(%arg0: i32, %arg1: i32) -> (i32, i32, i32, i32) {
    %c0_i32 = arith.constant 0 : i32
    %c0_i32_0 = arith.constant 0 : i32
    %c0_i32_1 = arith.constant 0 : i32
    return %arg0, %arg1, %c0_i32, %c0_i32_0 : i32, i32, i32, i32
  }
  func.func @transform_1(%arg0: i32, %arg1: i32) -> (i32, i32, i32, i32) {
    %c1_i32 = arith.constant 1 : i32
    %0 = arith.addi %arg1, %c1_i32 : i32
    %c4_i32 = arith.constant 4 : i32
    %1 = arith.muli %c4_i32, %0 : i32
    %c0_i32 = arith.constant 0 : i32
    %c0_i32_0 = arith.constant 0 : i32
    %c0_i32_1 = arith.constant 0 : i32
    return %arg0, %1, %c0_i32, %c0_i32_0 : i32, i32, i32, i32
  }
  func.func @transform_2(%arg0: i32, %arg1: i32) -> (i32, i32) {
    %c0_i32 = arith.constant 0 : i32
    %c0_i32_0 = arith.constant 0 : i32
    %c0_i32_1 = arith.constant 0 : i32
    return %c0_i32, %c0_i32_0 : i32, i32
  }
  func.func @transform_3(%arg0: i32, %arg1: i32) -> (i32, i32) {
    %c0_i32 = arith.constant 0 : i32
    %c0_i32_0 = arith.constant 0 : i32
    %c0_i32_1 = arith.constant 0 : i32
    return %c0_i32, %c0_i32_0 : i32, i32
  }
  func.func @transform_4(%arg0: i32, %arg1: i32) -> (i32, i32, i32) {
    %c0_i32 = arith.constant 0 : i32
    %c0_i32_0 = arith.constant 0 : i32
    return %arg0, %arg1, %c0_i32 : i32, i32, i32
  }
}

</mosaic_0001>

<bundles_post_ra>
// kernel: mobilenet_stem.1
= control target key start
LH: loop header
LB: loop body
LE: loop exit
PB: predicated region body
PF: predicated region fallthrough
CT: control target
= control target key end

     0   :  { %s2198_s0 = inlined_call_operand.vmem [shape: bf16[8,9,9,4], index: 0, kind: input, shape index: {}, may-alias: {0,1}]   ;;  %s2199_s1 = inlined_call_operand.vmem [shape: bf16[8,9,9,4], index: 1, kind: input, shape index: {}, may-alias: {0,1}]   ;;  %s2200_s2 = inlined_call_operand.vmem [shape: bf16[36,16], index: 2, kind: input, shape index: {}]   ;;  %s2201_s3 = inlined_call_operand.vmem [shape: f32[1,16], index: 3, kind: input, shape index: {}]   ;;  %s2202_s4 = inlined_call_operand.hbm [shape: f32[2,64,16], index: 4, kind: output, shape index: {}]  }
   0x1   :  { %2207 = sst [smem:[#allocation14_spill]] %s2198_s0 }
   0x2   :  { %9 = vsyncpa [#allocation6], 0 }
   0x3   :  { %11 = vsyncpa [#allocation6 + $0x1], 0  ;;  %s1784_s15 = smov 0   ;;  %s1786_s16 = smov 0  }
   0x4   :  { %s1788_s17 = smov 0   ;;  %s1790_s18 = smov 0  }
   0x5   :  { %s1792_s19 = smov 0   ;;  %s1794_s20 = smov 0  }
   0x6   :  { %s1796_s21 = smov 0   ;;  %s1798_s22 = smov 0  }
   0x7   :  { %s1800_s23 = smov 0   ;;  %s1802_s24 = smov 0  }
   0x8 LB: > { %2208 = sst [smem:[#allocation8_spill]] %s1711_s19  ;;  %s1306_s25 = sadd.s32 4294967295, %s1731_s24   ;;  %s1731_s24 = sphi %s1802_s24, %s17_s24   ;;  %s1727_s23 = sphi %s1800_s23, %s2238_s23   ;;  %s1723_s22 = sphi %s1798_s22, %s2237_s22   ;;  %s1719_s21 = sphi %s1796_s21, %s2236_s21   ;;  %s1715_s20 = sphi %s1794_s20, %s2235_s20   ;;  %s1711_s19 = sphi %s1792_s19, %s2228_s19   ;;  %s1707_s18 = sphi %s1790_s18, %s2234_s18   ;;  %s1703_s17 = sphi %s1788_s17, %s2233_s17   ;;  %s1699_s16 = sphi %s1786_s16, %s2232_s16   ;;  %s1695_s15 = sphi %s1784_s15, %s2231_s15  }
   0x9   : > { %s26_s27 = sadd.s32 1, %s1723_s22  ;;  %s29_s28 = sadd.s32 1, %s1727_s23 }
   0xa   : > { %p27_p0 = scmp.ge.s32.totalorder %s26_s27, 2  ;;  %s38_s29 = sadd.s32 1, %s1711_s19 }
   0xb   : > { %p45_p1 = scmp.ne.s32.totalorder %s1711_s19, %s1707_s18  ;;  %p46_p2 = scmp.eq.s32.totalorder %s1731_s24, 0 }
   0xc   : > { %s2240_s27 = smov (%p27_p0, %s26_s27), 0  ;;  %s2242_s28 = smov (!%p27_p0, %s29_s28), %s1727_s23 }
   0xd   : > { %2209 = sst [smem:[#allocation9_spill]] %s2240_s27  ;;  %s34_s30 = ssub.s32 %s1723_s22, %s2240_s27 }
   0xe   : > { %p1852_p3 = por %p46_p2, %p45_p1  ;;  %p31_p4 = scmp.ge.s32.totalorder %s2242_s28, 2 }
   0xf   : > { %s1394_s6 = sshll.u32 %s1723_s22, 2  ;;  %s1396_s8 = sshll.u32 %s2240_s27, 2 }
  0x10   : > { %s1395_s7 = sadd.s32 4, %s1394_s6  ;;  %s2244_s28 = smov (%p31_p4, %s2242_s28), 0 }
  0x11   : > { %2211 = sst [smem:[#allocation10_spill]] %s2244_s28  ;;  %s1397_s9 = sadd.s32 4, %s1396_s8 }
  0x12   : > { %s70_s10 = sadd.s32 1, %s1703_s17  ;;  %s33_s11 = ssub.s32 %s1727_s23, %s2244_s28 }
  0x13   : > { %s66_s12 = ssub.s32 %s1395_s7, %s1397_s9  ;;  %s35_s13 = sor.u32 %s34_s30, %s33_s11 }
  0x14   : > { %s67_s14 = sor.u32 %s66_s12, %s33_s11  ;;  %p36_p5 = scmp.eq.s32.totalorder %s35_s13, 0 }
  0x15   : > { %p68_p6 = scmp.eq.s32.totalorder %s67_s14, 0  ;;  %p77_p7 = scmp.ne.s32.totalorder %s1703_s17, %s1699_s16 }
  0x16   : > { %p151_p8 = scmp.eq.s32.totalorder %s1306_s25, 3  ;;  %p156_p11 = scmp.ne.s32.totalorder %s1707_s18, %s1695_s15 }
  0x17   : > { %s1866_s6 = scalar_select %p36_p5, %s1711_s19, %s38_s29  }
  0x18   : > { %s1869_s26 = scalar_select %p68_p6, %s1703_s17, %s70_s10  }
  0x19   : > { %2212 = sst [smem:[#allocation11_spill]] %s1866_s6  ;;  %p1873_p9 = por %p77_p7, %p46_p2 }
  0x1a   : > { %2213 = sst [smem:[#allocation12_spill]] %s1869_s26  ;;  %p1880_p10 = por %p151_p8, %p45_p1 }
  0x1b   : > { %s2216_s30 = sadd.s32 4294967294, %s1731_s24   ;;  %p1311_p0 = scmp.ge.s32.totalorder %s1731_s24, 4 }
  0x1c   : > { %p157_p12 = scmp.eq.s32.totalorder %s2216_s30, 3 }
  0x1d   : > { %179 = sbr.rel (%p1311_p0) target bundleno = 89 (0x59), region = 24 }
  0x1e   : > { %p1888_p13 = por %p157_p12, %p156_p11 }
  0x20   : > { %s2217_s7 = scalar_select %p1888_p13, 1, 0 }
  0x22   : > { %2218 = sst [smem:[#allocation13_spill]] %s2217_s7 }
  0x24   : > { %182 = sbr.rel (!%p1852_p3) target bundleno = 79 (0x4f), region = 28  ;;  %s184_s25 = sand.u32 (%p1852_p3), 1, %s1711_s19  }
  0x25   : > { %s1896_s29 = sshll.u32 (%p1852_p3), %s184_s25, 7  ;;  %s1399_s9 = sshll.u32 (%p1852_p3), %s1723_s22, 3 }
  0x26   : > { %s1418_s10 = smul.u32 (%p1852_p3), 72, %s1727_s23  ;;  %s2219_s0 = sld [smem:[#allocation14_spill]] (%p1852_p3) }
  0x27   : > { %s186_s28 = scalar_lea.vmem (%p1852_p3), [#allocation3], %s1896_s29   ;;  %s1913_s25 = smov (%p1852_p3), 0  }
  0x28   : > { %s197_s11 = sadd.s32 (%p1852_p3), %s1418_s10, %s1399_s9  ;;  %s2220_s5 = smov (%p1852_p3), %s186_s28 }
  0x29   : > { %s1320_s12 = sshll.u32 (%p1852_p3), %s197_s11, 2  ;;  %s1915_s19 = smov (%p1852_p3), 0  }
  0x2c   : > { %s1903_s30 = scalar_lea.vmem %s2219_s0, %s1320_s12  }
  0x2d   : > { %s2221_s6 = smov %s1903_s30 }
  0x2e LB: >> { %v219_v0 = vld [vmem:[%s1739_s6] sm:$0xf]  ;;  %v221_v1 = vld [vmem:[%s1739_s6 + $0x4] sm:$0xf]  ;;  %v223_v2 = vld [vmem:[%s1739_s6 + $0x8] sm:$0xf]  ;;  %s1747_s19 = sphi %s1915_s19, %s213_s19   ;;  %s1743_s25 = sphi %s1913_s25, %s2222_s25   ;;  %s1739_s6 = sphi %s2221_s6, %s288_s6   ;;  %s1735_s5 = sphi %s2220_s5, %s289_s5  }
  0x2f   : >> { %220 = vst [vmem:[%s1735_s5] sm:$0xf] %v219_v0  ;;  %222 = vst [vmem:[%s1735_s5 + $0x4] sm:$0xf] %v221_v1  ;;  %v225_v3 = vld [vmem:[%s1739_s6 + $0xc] sm:$0xf]  ;;  %s283_s9 = sadd.s32 1, %s1743_s25 }
  0x30   : >> { %224 = vst [vmem:[%s1735_s5 + $0x8] sm:$0xf] %v223_v2  ;;  %v227_v4 = vld [vmem:[%s1739_s6 + $0x10] sm:$0xf]  ;;  %v229_v5 = vld [vmem:[%s1739_s6 + $0x14] sm:$0xf] }
  0x31   : >> { %226 = vst [vmem:[%s1735_s5 + $0xc] sm:$0xf] %v225_v3  ;;  %228 = vst [vmem:[%s1735_s5 + $0x10] sm:$0xf] %v227_v4  ;;  %v231_v6 = vld [vmem:[%s1739_s6 + $0x18] sm:$0xf] }
  0x32   : >> { %230 = vst [vmem:[%s1735_s5 + $0x14] sm:$0xf] %v229_v5  ;;  %v233_v7 = vld [vmem:[%s1739_s6 + $0x1c] sm:$0xf]  ;;  %v235_v8 = vld [vmem:[%s1739_s6 + $0x48] sm:$0xf] }
  0x33   : >> { %232 = vst [vmem:[%s1735_s5 + $0x18] sm:$0xf] %v231_v6  ;;  %234 = vst [vmem:[%s1735_s5 + $0x1c] sm:$0xf] %v233_v7  ;;  %v237_v9 = vld [vmem:[%s1739_s6 + $0x4c] sm:$0xf] }
  0x34   : >> { %236 = vst [vmem:[%s1735_s5 + $0x20] sm:$0xf] %v235_v8  ;;  %v239_v10 = vld [vmem:[%s1739_s6 + $0x50] sm:$0xf]  ;;  %v241_v11 = vld [vmem:[%s1739_s6 + $0x54] sm:$0xf] }
  0x35   : >> { %238 = vst [vmem:[%s1735_s5 + $0x24] sm:$0xf] %v237_v9  ;;  %240 = vst [vmem:[%s1735_s5 + $0x28] sm:$0xf] %v239_v10  ;;  %v243_v12 = vld [vmem:[%s1739_s6 + $0x58] sm:$0xf] }
  0x36   : >> { %242 = vst [vmem:[%s1735_s5 + $0x2c] sm:$0xf] %v241_v11  ;;  %v245_v13 = vld [vmem:[%s1739_s6 + $0x5c] sm:$0xf]  ;;  %v247_v14 = vld [vmem:[%s1739_s6 + $0x60] sm:$0xf] }
  0x37   : >> { %244 = vst [vmem:[%s1735_s5 + $0x30] sm:$0xf] %v243_v12  ;;  %246 = vst [vmem:[%s1735_s5 + $0x34] sm:$0xf] %v245_v13  ;;  %v249_v15 = vld [vmem:[%s1739_s6 + $0x64] sm:$0xf] }
  0x38   : >> { %248 = vst [vmem:[%s1735_s5 + $0x38] sm:$0xf] %v247_v14  ;;  %v251_v16 = vld [vmem:[%s1739_s6 + $0x90] sm:$0xf]  ;;  %v253_v17 = vld [vmem:[%s1739_s6 + $0x94] sm:$0xf] }
  0x39   : >> { %250 = vst [vmem:[%s1735_s5 + $0x3c] sm:$0xf] %v249_v15  ;;  %252 = vst [vmem:[%s1735_s5 + $0x40] sm:$0xf] %v251_v16  ;;  %v255_v18 = vld [vmem:[%s1739_s6 + $0x98] sm:$0xf] }
  0x3a   : >> { %254 = vst [vmem:[%s1735_s5 + $0x44] sm:$0xf] %v253_v17  ;;  %v257_v19 = vld [vmem:[%s1739_s6 + $0x9c] sm:$0xf]  ;;  %v259_v20 = vld [vmem:[%s1739_s6 + $0xa0] sm:$0xf] }
  0x3b   : >> { %256 = vst [vmem:[%s1735_s5 + $0x48] sm:$0xf] %v255_v18  ;;  %258 = vst [vmem:[%s1735_s5 + $0x4c] sm:$0xf] %v257_v19  ;;  %v261_v21 = vld [vmem:[%s1739_s6 + $0xa4] sm:$0xf] }
  0x3c   : >> { %260 = vst [vmem:[%s1735_s5 + $0x50] sm:$0xf] %v259_v20  ;;  %v263_v22 = vld [vmem:[%s1739_s6 + $0xa8] sm:$0xf]  ;;  %v265_v23 = vld [vmem:[%s1739_s6 + $0xac] sm:$0xf] }
  0x3d   : >> { %262 = vst [vmem:[%s1735_s5 + $0x54] sm:$0xf] %v261_v21  ;;  %264 = vst [vmem:[%s1735_s5 + $0x58] sm:$0xf] %v263_v22  ;;  %v267_v24 = vld [vmem:[%s1739_s6 + $0xd8] sm:$0xf] }
  0x3e   : >> { %266 = vst [vmem:[%s1735_s5 + $0x5c] sm:$0xf] %v265_v23  ;;  %v269_v25 = vld [vmem:[%s1739_s6 + $0xdc] sm:$0xf]  ;;  %v271_v26 = vld [vmem:[%s1739_s6 + $0xe0] sm:$0xf] }
  0x3f   : >> { %268 = vst [vmem:[%s1735_s5 + $0x60] sm:$0xf] %v267_v24  ;;  %270 = vst [vmem:[%s1735_s5 + $0x64] sm:$0xf] %v269_v25  ;;  %v273_v27 = vld [vmem:[%s1739_s6 + $0xe4] sm:$0xf] }
  0x40   : >> { %272 = vst [vmem:[%s1735_s5 + $0x68] sm:$0xf] %v271_v26  ;;  %v275_v28 = vld [vmem:[%s1739_s6 + $0xe8] sm:$0xf]  ;;  %v277_v29 = vld [vmem:[%s1739_s6 + $0xec] sm:$0xf] }
  0x41   : >> { %274 = vst [vmem:[%s1735_s5 + $0x6c] sm:$0xf] %v273_v27  ;;  %276 = vst [vmem:[%s1735_s5 + $0x70] sm:$0xf] %v275_v28  ;;  %v279_v30 = vld [vmem:[%s1739_s6 + $0xf0] sm:$0xf] }
  0x42   : >> { %278 = vst [vmem:[%s1735_s5 + $0x74] sm:$0xf] %v277_v29  ;;  %v281_v31 = vld [vmem:[%s1739_s6 + $0xf4] sm:$0xf]  ;;  %280 = vst [vmem:[%s1735_s5 + $0x78] sm:$0xf] %v279_v30 }
  0x43   : >> { %282 = vst [vmem:[%s1735_s5 + $0x7c] sm:$0xf] %v281_v31  ;;  %p284_p1 = scmp.ge.s32.totalorder %s283_s9, 1  ;;  %s213_s19 = sadd.s32 1, %s1747_s19  }
  0x44   : >> { %p212_p2 = scmp.ge.s32.totalorder %s213_s19, 1 }
  0x45   : >> { %s2246_s9 = smov (%p284_p1, %s283_s9), 0 }
  0x46   : >> { %s1324_s10 = sshll.u32 %s2246_s9, 5  ;;  %s2222_s25 = smov %s2246_s9 }
  0x47   : >> { %s288_s6 = scalar_lea.vmem %s1903_s30, %s1324_s10   ;;  %s289_s5 = scalar_lea.vmem %s186_s28, %s1324_s10 [#allocation3]  }
  0x48   : > { %215 = sbr.rel (!%p212_p2) target bundleno = 46 (0x2e), region = 207 }
  0x4f PF: > { %479 = sbr.rel (!%p1873_p9) target bundleno = 89 (0x59), region = 90  ;;  %s481_s11 = sand.u32 (%p1873_p9), 1, %s1703_s17  }
  0x50   : > { %s1333_s12 = sshll.u32 (%p1873_p9), %s1723_s22, 3  ;;  %s1332_s13 = sshll.u32 (%p1873_p9), %s481_s11, 5 }
  0x51   : > { %s1209_s14 = smul.u32 (%p1873_p9), 72, %s1727_s23  ;;  %s483_s19 = scalar_lea.vmem (%p1873_p9), [#allocation4], %s1332_s13 }
  0x53   : > { %s1210_s10 = sadd.s32 (%p1873_p9), %s1333_s12, %s1209_s14 }
  0x54   : > { %s1334_s0 = sshll.u32 (%p1873_p9), %s1210_s10, 2 }
  0x55   : > { %s1212_s9 = scalar_lea.vmem (%p1873_p9), %s2199_s1, %s1334_s0 }
  0x56   : > { %v1335_v32 = vld [vmem:[%s1212_s9 + $0x20] sm:$0xff]   ;;  %v1337_v33 = vld [vmem:[%s1212_s9 + $0x68] sm:$0xff]   ;;  %v1339_v34 = vld [vmem:[%s1212_s9 + $0xb0] sm:$0xff]  }
  0x57   : > { %508 = vst [vmem:[%s483_s19] sm:$0xff] %v1335_v32   ;;  %512 = vst [vmem:[%s483_s19 + $0x8] sm:$0xff] %v1337_v33   ;;  %v1341_v35 = vld [vmem:[%s1212_s9 + $0xf8] sm:$0xff]  }
  0x58   : > { %516 = vst [vmem:[%s483_s19 + $0x10] sm:$0xff] %v1339_v34   ;;  %520 = vst [vmem:[%s483_s19 + $0x18] sm:$0xff] %v1341_v35  }
  0x59 PF: > { %p1343_p3 = scmp.ge.s32.totalorder %s1731_s24, 1  ;;  %p560_p4 = scmp.lt.s32.totalorder %s1731_s24, 5 }
  0x5b   : > { %p561_p5 = pnand %p1343_p3, %p560_p4 }
  0x5c   : > { %s2017_s26 = sand.u32 (!%p561_p5), 1, %s1707_s18   ;;  %vm658_vm0 = vsmask.f32 (!%p561_p5), 3328  ;;  %s1749_s28 = smov (!%p561_p5), 4   ;;  %vm659_vm1 = vsmask.f32 (!%p561_p5), 7440 }
  0x5d   : > { %564 = sbr.rel (%p561_p5) target bundleno = 524 (0x20c), region = 131  ;;  %s1344_s0 = sshll.u32 (!%p561_p5), %s2017_s26, 7  ;;  %vm2035_vm2 = vmor (!%p561_p5), %vm658_vm0, %vm659_vm1  ;;  %vm619_vm3 = vcmask (!%p561_p5), 27648   ;;  %vm1045_vm4 = vcmask (!%p561_p5), 1041408   ;;  %vm645_vm5 = vcmask (!%p561_p5), 60448   ;;  %vm729_vm6 = vcmask (!%p561_p5), 93248  }
  0x5e   : > { %s2020_s27 = scalar_lea.vmem (!%p561_p5), [#allocation3], %s1344_s0  ;;  %s1750_s6 = smov (!%p561_p5), 8   ;;  %vm755_vm7 = vcmask (!%p561_p5), 126048   ;;  %vm781_vm8 = vcmask (!%p561_p5), 158848   ;;  %vm862_vm9 = vcmask (!%p561_p5), 191648   ;;  %vm888_vm10 = vcmask (!%p561_p5), 224448  }
  0x5f   : > { %v1349_v36 = vld [vmem:[%s2020_s27 + $0x30] sm:$0xf] (!%p561_p5)  ;;  %v1347_v37 = vld [vmem:[%s2020_s27 + $0x20] sm:$0xf] (!%p561_p5)  ;;  %v1350_v38 = vld [vmem:[%s2020_s27 + $0x38] sm:$0xf] (!%p561_p5) }
  0x60   : > { %637 = vrot.lane.b32.xlu1 (!%p561_p5), %v1349_v36, %s1749_s28  ;;  %633 = vrot.lane.b32.xlu0 (!%p561_p5), %v1347_v37, %s1749_s28  ;;  %v1348_v39 = vld [vmem:[%s2020_s27 + $0x28] sm:$0xf] (!%p561_p5)  ;;  %v653_v41 = vld [vmem:[%s2020_s27 + $0xc] sm:$0x1] (!%p561_p5)  ;;  %s1751_s7 = smov (!%p561_p5), 12   ;;  %s1752_s29 = smov (!%p561_p5), 16  }
  0x61   : > { %v652_v40 = vld [vmem:[%s2020_s27 + $0x8] sm:$0xf] (!%p561_p5)  ;;  %v650_v44 = vld [vmem:[%s2020_s27] sm:$0xf] (!%p561_p5)  ;;  %v685_v45 = vshll.u32 (!%p561_p5), %v653_v41, 16  ;;  %s574_s30 = sand.u32 (!%p561_p5), 1, %s1699_s16  }
  0x62   : > { %v676_v42 = vshrl.u32 (!%p561_p5), %v652_v40, 16  ;;  %v679_v43 = vshll.u32 (!%p561_p5), %v652_v40, 16  ;;  %v651_v46 = vld [vmem:[%s2020_s27 + $0x4] sm:$0x1] (!%p561_p5)  ;;  %v662_v47 = vshrl.u32 (!%p561_p5), %v650_v44, 16  ;;  %v665_v48 = vshll.u32 (!%p561_p5), %v650_v44, 16 }
  0x63   : > { %v671_v51 = vshll.u32 (!%p561_p5), %v651_v46, 16  ;;  %v656_v52 = vld [vmem:[%s2020_s27 + $0x18] sm:$0xf] (!%p561_p5)  ;;  %v687_v53 = vrot.slane (!%p561_p5), %v685_v45, 5  ;;  %v657_v56 = vld [vmem:[%s2020_s27 + $0x1c] sm:$0x1] (!%p561_p5) }
  0x64   : > { %v678_v49 = vrot.slane %v676_v42, 4  ;;  %v681_v50 = vrot.slane %v679_v43, 5  ;;  %639 = vrot.lane.b32.xlu1 %v1350_v38, %s1749_s28  ;;  %635 = vrot.lane.b32.xlu0 %v1348_v39, %s1749_s28  ;;  %v664_v54 = vrot.slane %v662_v47, 4  ;;  %v667_v55 = vrot.slane %v665_v48, 5  ;;  %v654_v62 = vld [vmem:[%s2020_s27 + $0x10] sm:$0xf] }
  0x65   : > { %v704_v57 = vshrl.u32 %v656_v52, 16  ;;  %v673_v59 = vrot.slane %v671_v51, 5  ;;  %v707_v60 = vshll.u32 %v656_v52, 16  ;;  %v713_v61 = vshll.u32 %v657_v56, 16  ;;  %v655_v2 = vld [vmem:[%s2020_s27 + $0x14] sm:$0x1] }
  0x66   : > { %v682_v58 = vor.u32 %v681_v50, %v678_v49  ;;  %v668_v0 = vor.u32 %v667_v55, %v664_v54  ;;  %v690_v3 = vshrl.u32 %v654_v62, 16  ;;  %v693_v4 = vshll.u32 %v654_v62, 16  ;;  %v1361_v19 = vld [vmem:[%s2020_s27 + $0x48] sm:$0xf]  ;;  %v1359_v21 = vld [vmem:[%s2020_s27 + $0x40] sm:$0xf] }
  0x67   : > { %v706_v1 = vrot.slane %v704_v57, 4  ;;  %v709_v6 = vrot.slane %v707_v60, 5  ;;  %v699_v7 = vshll.u32 %v655_v2, 16  ;;  %v715_v13 = vrot.slane %v713_v61, 5  ;;  %v1352_v23 = vld [vmem:[%s2020_s27 + $0x48] sm:$0xf] }
  0x68   : > { %v683_v5 = vrot.slane %v682_v58, 4  ;;  %v669_v8 = vrot.slane %v668_v0, 4  ;;  %v692_v9 = vrot.slane %v690_v3, 4  ;;  %v695_v10 = vrot.slane %v693_v4, 5  ;;  %v1351_v26 = vld [vmem:[%s2020_s27 + $0x40] sm:$0xf] }
  0x69   : > { %v710_v12 = vor.u32 %v709_v6, %v706_v1  ;;  %v701_v16 = vrot.slane %v699_v7, 5  ;;  %v809_v24 = vshrl.u32 %v1361_v19, 16  ;;  %v812_v25 = vshll.u32 %v1361_v19, 16  ;;  %v1365_v29 = vld [vmem:[%s2020_s27 + $0x58] sm:$0xf]  ;;  %s1753_s5 = smov 20  }
  0x6a   : > { %v688_v11 = vsel %vm2035_vm2, %v683_v5, %v687_v53  ;;  %v674_v14 = vsel %vm2035_vm2, %v669_v8, %v673_v59  ;;  %v696_v15 = vor.u32 %v695_v10, %v692_v9  ;;  %v795_v27 = vshrl.u32 %v1359_v21, 16  ;;  %v1363_v30 = vld [vmem:[%s2020_s27 + $0x50] sm:$0xf]  ;;  %v1354_v31 = vld [vmem:[%s2020_s27 + $0x58] sm:$0xf]  ;;  %s1345_s25 = sshll.u32 %s574_s30, 5 }
  0x6b   : > { %719 = vrot.lane.b32.xlu1 %v688_v11, %s1750_s6  ;;  %717 = vrot.lane.b32.xlu0 %v674_v14, %s1750_s6  ;;  %v711_v17 = vrot.slane %v710_v12, 4  ;;  %v798_v28 = vshll.u32 %v1359_v21, 16  ;;  %v1353_v32 = vld [vmem:[%s2020_s27 + $0x50] sm:$0xf]  ;;  %v811_v33 = vrot.slane %v809_v24, 4  ;;  %v814_v34 = vrot.slane %v812_v25, 5 }
  0x6c   : > { %v697_v18 = vrot.slane %v696_v15, 4  ;;  %v837_v35 = vshrl.u32 %v1365_v29, 16  ;;  %v840_v36 = vshll.u32 %v1365_v29, 16  ;;  %v1362_v37 = vld [vmem:[%s2020_s27 + $0x4c] sm:$0x1]  ;;  %v797_v38 = vrot.slane %v795_v27, 4 }
  0x6d   : > { %v716_v20 = vsel %vm2035_vm2, %v711_v17, %v715_v13  ;;  %v800_v39 = vrot.slane %v798_v28, 5  ;;  %v823_v40 = vshrl.u32 %v1363_v30, 16  ;;  %v826_v41 = vshll.u32 %v1363_v30, 16  ;;  %v1360_v42 = vld [vmem:[%s2020_s27 + $0x44] sm:$0x1]  ;;  %s2089_s16 = scalar_lea.vmem [#allocation4], %s1345_s25 }
  0x6e   : > { %v702_v22 = vsel %vm2035_vm2, %v697_v18, %v701_v16  ;;  %v1356_v43 = vld [vmem:[%s2020_s27 + $0x68] sm:$0xf]  ;;  %v1355_v44 = vld [vmem:[%s2020_s27 + $0x60] sm:$0xf]  ;;  %v815_v45 = vor.u32 %v814_v34, %v811_v33  ;;  %v818_v46 = vshll.u32 %v1362_v37, 16  ;;  %v839_v47 = vrot.slane %v837_v35, 4 }
  0x6f   : > { %723 = vrot.lane.b32.xlu1 %v716_v20, %s1750_s6  ;;  %721 = vrot.lane.b32.xlu0 %v702_v22, %s1750_s6  ;;  %v842_v48 = vrot.slane %v840_v36, 5  ;;  %v801_v49 = vor.u32 %v800_v39, %v797_v38  ;;  %v804_v50 = vshll.u32 %v1360_v42, 16  ;;  %v1366_v51 = vld [vmem:[%s2020_s27 + $0x5c] sm:$0x1]  ;;  %v825_v52 = vrot.slane %v823_v40, 4  ;;  %s1754_s11 = smov 24  }
  0x70   : > { %v828_v53 = vrot.slane %v826_v41, 5  ;;  %v1364_v54 = vld [vmem:[%s2020_s27 + $0x54] sm:$0x1]  ;;  %v1358_v55 = vld [vmem:[%s2020_s27 + $0x78] sm:$0xf]  ;;  %v816_v57 = vrot.slane %v815_v45, 4 }
  0x71   : > { %v1357_v56 = vld [vmem:[%s2020_s27 + $0x70] sm:$0xf]  ;;  %v820_v58 = vrot.slane %v818_v46, 5  ;;  %v843_v59 = vor.u32 %v842_v48, %v839_v47  ;;  %v846_v60 = vshll.u32 %v1366_v51, 16  ;;  %v802_v61 = vrot.slane %v801_v49, 4  ;;  %v1580_v49 = vld [vmem:[%s2200_s2 + $0x8] sm:$0xff]  }
  0x72   : > { %v806_v62 = vrot.slane %v804_v50, 5  ;;  %v829_v0 = vor.u32 %v828_v53, %v825_v52  ;;  %v832_v1 = vshll.u32 %v1364_v54, 16  ;;  %v617_v2 = vld [vmem:[%s2020_s27 + $0x10] sm:$0xf]  ;;  %v615_v3 = vld [vmem:[%s2020_s27] sm:$0xf] }
  0x73   : > { %745 = vrot.lane.b32.xlu1 %v1352_v23, %s1751_s7  ;;  %743 = vrot.lane.b32.xlu0 %v1351_v26, %s1751_s7  ;;  %622 = vst.msk [vmem:[#allocation2 + $0x8] sm:$0xf] %vm619_vm3, %v617_v2  ;;  %v618_v4 = vld [vmem:[%s2020_s27 + $0x18] sm:$0xf]  ;;  %620 = vst.msk [vmem:[#allocation2] sm:$0xf] %vm619_vm3, %v615_v3  ;;  %v821_v6 = vsel %vm2035_vm2, %v816_v57, %v820_v58 }
  0x74   : > { %623 = vst.msk [vmem:[#allocation2 + $0xc] sm:$0xf] %vm619_vm3, %v618_v4  ;;  %v616_v5 = vld [vmem:[%s2020_s27 + $0x8] sm:$0xf]  ;;  %v844_v7 = vrot.slane %v843_v59, 4  ;;  %v848_v8 = vrot.slane %v846_v60, 5  ;;  %v807_v9 = vsel %vm2035_vm2, %v802_v61, %v806_v62 }
  0x75   : > { %621 = vst.msk [vmem:[#allocation2 + $0x4] sm:$0xf] %vm619_vm3, %v616_v5  ;;  %v830_v10 = vrot.slane %v829_v0, 4  ;;  %v834_v11 = vrot.slane %v832_v1, 5  ;;  %v1376_v14 = vld [vmem:[%s2020_s27 + $0x10] sm:$0xf] }
  0x76   : > { %v849_v12 = vsel %vm2035_vm2, %v844_v7, %v848_v8  ;;  %v1374_v15 = vld [vmem:[%s2020_s27 + $0x8] sm:$0xf]  ;;  %v1368_v16 = vld [vmem:[%s2020_s27 + $0x10] sm:$0xf]  ;;  %v943_v17 = vshrl.u32 %v1376_v14, 16  ;;  %v946_v18 = vshll.u32 %v1376_v14, 16 }
  0x77   : > { %749 = vrot.lane.b32.xlu1 %v1354_v31, %s1751_s7  ;;  %747 = vrot.lane.b32.xlu0 %v1353_v32, %s1751_s7  ;;  %v835_v13 = vsel %vm2035_vm2, %v830_v10, %v834_v11  ;;  %v1367_v19 = vld [vmem:[%s2020_s27 + $0x8] sm:$0xf]  ;;  %v926_v20 = vld [vmem:[%s2089_s16] sm:$0xf]  ;;  %v929_v21 = vshrl.u32 %v1374_v15, 16  ;;  %v932_v22 = vshll.u32 %v1374_v15, 16 }
  0x78   : > { %v1378_v23 = vld [vmem:[%s2020_s27 + $0x18] sm:$0xf]  ;;  %v871_v24 = vld [vmem:[%s2089_s16] sm:$0xf]  ;;  %v945_v26 = vrot.slane %v943_v17, 4  ;;  %v948_v27 = vrot.slane %v946_v18, 5 }
  0x79   : > { %v1369_v25 = vld [vmem:[%s2020_s27 + $0x18] sm:$0xf]  ;;  %v971_v28 = vshrl.u32 %v926_v20, 16  ;;  %v974_v29 = vshll.u32 %v926_v20, 16  ;;  %v1377_v30 = vld [vmem:[%s2020_s27 + $0x14] sm:$0x1] }
  0x7a   : > { %v931_v31 = vrot.slane %v929_v21, 4  ;;  %v934_v32 = vrot.slane %v932_v22, 5  ;;  %v957_v33 = vshrl.u32 %v1378_v23, 16  ;;  %v960_v34 = vshll.u32 %v1378_v23, 16  ;;  %v1375_v35 = vld [vmem:[%s2020_s27 + $0xc] sm:$0x1] }
  0x7b   : > { %771 = vrot.lane.b32.xlu1 %v1356_v43, %s1752_s29  ;;  %769 = vrot.lane.b32.xlu0 %v1355_v44, %s1752_s29  ;;  %v1579_v36 = vld [vmem:[%s2200_s2] sm:$0xff]   ;;  %v1370_v38 = vld [vmem:[%s2020_s27 + $0x28] sm:$0xf]  ;;  %v949_v39 = vor.u32 %v948_v27, %v945_v26  ;;  %v952_v40 = vshll.u32 %v1377_v30, 16  ;;  %v973_v41 = vrot.slane %v971_v28, 4  ;;  %v976_v42 = vrot.slane %v974_v29, 5 }
  0x7c   : > { %v1371_v37 = vld [vmem:[%s2020_s27 + $0x30] sm:$0xf]  ;;  %1407 = vmatprep.subr.bf16.mxu0 %v1579_v36  ;;  %v935_v43 = vor.u32 %v934_v32, %v931_v31  ;;  %v938_v44 = vshll.u32 %v1375_v35, 16  ;;  %v927_v45 = vld [vmem:[%s2089_s16 + $0x4] sm:$0x1]  ;;  %v959_v46 = vrot.slane %v957_v33, 4 }
  0x7d   : > { %v962_v47 = vrot.slane %v960_v34, 5  ;;  %1408 = vmatpush3.bf16.msra.mxu0 %v1579_v36  ;;  %v1379_v48 = vld [vmem:[%s2020_s27 + $0x1c] sm:$0x1]  ;;  %s1755_s9 = smov 28   ;;  %v1373_v51 = vld [vmem:[%s2089_s16 + $0x8] sm:$0xf]  ;;  %v977_v54 = vor.u32 %v976_v42, %v973_v41 }
  0x7e   : > { %v1581_v50 = vld [vmem:[%s2200_s2 + $0x10] ss:$0 sps:$4 sm:$0x33]   ;;  %v950_v52 = vrot.slane %v949_v39, 4  ;;  %v954_v53 = vrot.slane %v952_v40, 5  ;;  %1409 = vmatprep.subr.bf16.mxu0 %v1580_v49  ;;  %v936_v57 = vrot.slane %v935_v43, 4 }
  0x7f   : > { %775 = vrot.lane.b32.xlu1 %v1358_v55, %s1752_s29  ;;  %773 = vrot.lane.b32.xlu0 %v1357_v56, %s1752_s29  ;;  %v980_v55 = vshll.u32 %v927_v45, 16  ;;  %v1372_v56 = vld [vmem:[%s2020_s27 + $0x38] sm:$0xf]  ;;  %v940_v58 = vrot.slane %v938_v44, 5  ;;  %v963_v59 = vor.u32 %v962_v47, %v959_v46  ;;  %v966_v60 = vshll.u32 %v1379_v48, 16  ;;  %s1756_s27 = smov 32  }
  0x80   : > { %v955_v61 = vsel %vm2035_vm2, %v950_v52, %v954_v53  ;;  %v978_v62 = vrot.slane %v977_v54, 4  ;;  %v1047_v1 = vsel %vm1045_vm4, %v1581_v50, 0  ;;  %vm915_vm11 = vcmask 257248   ;;  %v1382_v40 = vld [vmem:[%s2201_s3] ss:$0 sm:$0xff]  ;;  %s1389_s29 = sshll.u32 %s1715_s20, 2 }
  0x81   : > { %1410 = vmatpush3.bf16.msra.mxu0 %v1580_v49  ;;  %v982_v0 = vrot.slane %v980_v55, 5  ;;  %v941_v2 = vsel %vm2035_vm2, %v936_v57, %v940_v58  ;;  %v964_v3 = vrot.slane %v963_v59, 4  ;;  %v968_v4 = vrot.slane %v966_v60, 5  ;;  %s1390_s30 = sshll.u32 %s1719_s21, 3  ;;  %s1124_s14 = scalar_lea.sflag [#allocation6], %s2017_s26 }
  0x82   : > { %1417 = vmatprep.subr.msk.bf16.mxu0 %vm1045_vm4, %v1581_v50  ;;  %vm996_vm12 = vcmask 290048   ;;  %vm1038_vm13 = vcmask 293888   ;;  %s1136_s25 = sadd.s32 %s1390_s30, %s1389_s29  ;;  %vm1118_vm14 = vcmask 130048  }
  0x83   : > { %852 = vrot.lane.b32.xlu1 %v821_v6, %s1753_s5  ;;  %850 = vrot.lane.b32.xlu0 %v807_v9, %s1753_s5  ;;  %v983_v5 = vsel %vm2035_vm2, %v978_v62, %v982_v0  ;;  %v969_v6 = vsel %vm2035_vm2, %v964_v3, %v968_v4  ;;  %s1391_s16 = sshll.u32 %s1136_s25, 7 }
  0x84   : > { %s2132_s13 = scalar_lea.hbm %s2202_s4, %s1391_s16 }
  0x85   : > { %1412 = vmatpush3.bf16.msra.mxu0 %v1047_v1 }
  0x87   : > { %856 = vrot.lane.b32.xlu1 %v849_v12, %s1753_s5  ;;  %854 = vrot.lane.b32.xlu0 %v835_v13, %s1753_s5  ;;  %s1346_s5 = sshll.u32 %s2017_s26, 5 }
  0x88   : > { %s602_s20 = scalar_lea.vmem [#allocation5], %s1346_s5 }
  0x89   : > { %s1139_s21 = sshll.u32 %s602_s20, 4  ;;  %s2135_s21 = int_to_ptr.vmem [resolvable:$true] %s1139_s21 }
  0x8a   : > { %s1584_s10 = scalar_lea.vmem %s2135_s21, 512 }
  0x8b   : > { %878 = vrot.lane.b32.xlu1 %v1368_v16, %s1754_s11  ;;  %876 = vrot.lane.b32.xlu0 %v1367_v19, %s1754_s11  ;;  %p1585_p6 = scmp.ne.s32.totalorder %s2135_s21, %s1584_s10 }
  0x8d   : > { %p1586_p7 = pnand %p1585_p6, %p1880_p10 }
  0x8f   : > { %882 = vrot.lane.b32.xlu1 %v871_v24, %s1754_s11  ;;  %880 = vrot.lane.b32.xlu0 %v1369_v25, %s1754_s11  ;;  %p1587_p8 = pneg %p1586_p7 }
  0x93   : > { %905 = vrot.lane.b32.xlu1 %v1371_v37, %s1755_s9  ;;  %903 = vrot.lane.b32.xlu0 %v1370_v38, %s1755_s9 }
  0x97   : > { %909 = vrot.lane.b32.xlu1 %v1373_v51, %s1755_s9  ;;  %907 = vrot.lane.b32.xlu0 %v1372_v56, %s1755_s9  ;;  %s1757_s9 = smov [#allocation5]  }
  0x98   : > { %s1588_s19 = sshll.u32 %s1757_s9, 4  ;;  %s1589_s19 = int_to_ptr.vmem [resolvable:$false] %s1588_s19 }
  0x99   : > { %s1590_s0 = scalar_lea.vmem %s1589_s19, 1024  ;;  %p1591_p9 = scmp.lt.s32.totalorder %s2135_s21, %s1589_s19 }
  0x9a   : > { %p1592_p11 = scmp.lt.s32.totalorder %s1590_s0, %s1584_s10 }
  0x9b   : > { %986 = vrot.lane.b32.xlu1 %v955_v61, %s1756_s27  ;;  %984 = vrot.lane.b32.xlu0 %v941_v2, %s1756_s27 }
  0x9c   : > { %p1593_p12 = por %p1592_p11, %p1591_p9 }
  0x9e   : > { %p1594_p0 = pnand %p1593_p12, %p1587_p8 }
  0x9f   : > { %990 = vrot.lane.b32.xlu1 %v983_v5, %s1756_s27  ;;  %988 = vrot.lane.b32.xlu0 %v969_v6, %s1756_s27 }
  0xd2   : > { %v638_v7 = vpop.permute.xlu1 %637  ;;  %v634_v8 = vpop.permute.xlu0 %633 }
  0xd3   : > { %648 = vst.msk [vmem:[#allocation2 + $0x8] sm:$0xf] %vm645_vm5, %v638_v7  ;;  %646 = vst.msk [vmem:[#allocation2] sm:$0xf] %vm645_vm5, %v634_v8 }
  0xd6   : > { %v640_v9 = vpop.permute.xlu1 %639  ;;  %v636_v10 = vpop.permute.xlu0 %635 }
  0xd7   : > { %649 = vst.msk [vmem:[#allocation2 + $0xc] sm:$0xf] %vm645_vm5, %v640_v9  ;;  %647 = vst.msk [vmem:[#allocation2 + $0x4] sm:$0xf] %vm645_vm5, %v636_v10 }
  0xdd   : > { %v720_v11 = vpop.permute.xlu1 %719  ;;  %v718_v12 = vpop.permute.xlu0 %717 }
  0xde   : > { %731 = vst.msk [vmem:[#allocation2 + $0x4] sm:$0xf] %vm729_vm6, %v720_v11  ;;  %730 = vst.msk [vmem:[#allocation2] sm:$0xf] %vm729_vm6, %v718_v12 }
  0xe1   : > { %v724_v13 = vpop.permute.xlu1 %723  ;;  %v722_v63 = vpop.permute.xlu0 %721 }
  0xe2   : > { %733 = vst.msk [vmem:[#allocation2 + $0xc] sm:$0xf] %vm729_vm6, %v724_v13  ;;  %732 = vst.msk [vmem:[#allocation2 + $0x8] sm:$0xf] %vm729_vm6, %v722_v63 }
  0xe5   : > { %v746_v14 = vpop.permute.xlu1 %745  ;;  %v744_v15 = vpop.permute.xlu0 %743 }
  0xe6   : > { %757 = vst.msk [vmem:[#allocation2 + $0x4] sm:$0xf] %vm755_vm7, %v746_v14  ;;  %756 = vst.msk [vmem:[#allocation2] sm:$0xf] %vm755_vm7, %v744_v15 }
  0xe9   : > { %v750_v16 = vpop.permute.xlu1 %749  ;;  %v748_v17 = vpop.permute.xlu0 %747 }
  0xea   : > { %759 = vst.msk [vmem:[#allocation2 + $0xc] sm:$0xf] %vm755_vm7, %v750_v16  ;;  %758 = vst.msk [vmem:[#allocation2 + $0x8] sm:$0xf] %vm755_vm7, %v748_v17 }
  0xed   : > { %v772_v18 = vpop.permute.xlu1 %771  ;;  %v770_v19 = vpop.permute.xlu0 %769 }
  0xee   : > { %783 = vst.msk [vmem:[#allocation2 + $0x4] sm:$0xf] %vm781_vm8, %v772_v18  ;;  %782 = vst.msk [vmem:[#allocation2] sm:$0xf] %vm781_vm8, %v770_v19 }
  0xf1   : > { %v776_v20 = vpop.permute.xlu1 %775  ;;  %v774_v21 = vpop.permute.xlu0 %773 }
  0xf2   : > { %785 = vst.msk [vmem:[#allocation2 + $0xc] sm:$0xf] %vm781_vm8, %v776_v20  ;;  %784 = vst.msk [vmem:[#allocation2 + $0x8] sm:$0xf] %vm781_vm8, %v774_v21 }
  0xf5   : > { %v853_v22 = vpop.permute.xlu1 %852  ;;  %v851_v23 = vpop.permute.xlu0 %850 }
  0xf6   : > { %864 = vst.msk [vmem:[#allocation2 + $0x4] sm:$0xf] %vm862_vm9, %v853_v22  ;;  %863 = vst.msk [vmem:[#allocation2] sm:$0xf] %vm862_vm9, %v851_v23 }
  0xf9   : > { %v857_v24 = vpop.permute.xlu1 %856  ;;  %v855_v25 = vpop.permute.xlu0 %854 }
  0xfa   : > { %866 = vst.msk [vmem:[#allocation2 + $0xc] sm:$0xf] %vm862_vm9, %v857_v24  ;;  %865 = vst.msk [vmem:[#allocation2 + $0x8] sm:$0xf] %vm862_vm9, %v855_v25 }
  0xfd   : > { %v879_v26 = vpop.permute.xlu1 %878  ;;  %v877_v27 = vpop.permute.xlu0 %876 }
  0xfe   : > { %890 = vst.msk [vmem:[#allocation2 + $0x4] sm:$0xf] %vm888_vm10, %v879_v26  ;;  %889 = vst.msk [vmem:[#allocation2] sm:$0xf] %vm888_vm10, %v877_v27 }
 0x101   : > { %v883_v28 = vpop.permute.xlu1 %882  ;;  %v881_v29 = vpop.permute.xlu0 %880 }
 0x102   : > { %892 = vst.msk [vmem:[#allocation2 + $0xc] sm:$0xf] %vm888_vm10, %v883_v28  ;;  %891 = vst.msk [vmem:[#allocation2 + $0x8] sm:$0xf] %vm888_vm10, %v881_v29 }
 0x105   : > { %v906_v30 = vpop.permute.xlu1 %905  ;;  %v904_v31 = vpop.permute.xlu0 %903 }
 0x106   : > { %917 = vst.msk [vmem:[#allocation2 + $0x4] sm:$0xf] %vm915_vm11, %v906_v30  ;;  %916 = vst.msk [vmem:[#allocation2] sm:$0xf] %vm915_vm11, %v904_v31 }
 0x109   : > { %v910_v32 = vpop.permute.xlu1 %909  ;;  %v908_v33 = vpop.permute.xlu0 %907 }
 0x10a   : > { %919 = vst.msk [vmem:[#allocation2 + $0xc] sm:$0xf] %vm915_vm11, %v910_v32  ;;  %918 = vst.msk [vmem:[#allocation2 + $0x8] sm:$0xf] %vm915_vm11, %v908_v33 }
 0x10d   : > { %v987_v34 = vpop.permute.xlu1 %986  ;;  %v985_v35 = vpop.permute.xlu0 %984 }
 0x10e   : > { %998 = vst.msk [vmem:[#allocation2 + $0x4] sm:$0xf] %vm996_vm12, %v987_v34  ;;  %997 = vst.msk [vmem:[#allocation2] sm:$0xf] %vm996_vm12, %v985_v35 }
 0x111   : > { %v991_v36 = vpop.permute.xlu1 %990  ;;  %v989_v37 = vpop.permute.xlu0 %988 }
 0x112   : > { %1000 = vst.msk [vmem:[#allocation2 + $0xc] sm:$0xf] %vm996_vm12, %v991_v36  ;;  %999 = vst.msk [vmem:[#allocation2 + $0x8] sm:$0xf] %vm996_vm12, %v989_v37 }
 0x115   : > { %v1582_v38 = vld [vmem:[#allocation2] sm:$0xff]  }
 0x116   : > { %1413 = vmatprep.mubr.msk.bf16.mxu0 %vm1038_vm13, %v1582_v38 }
 0x119   : > { %v1583_v39 = vld [vmem:[#allocation2 + $0x8] sm:$0xff]  }
 0x11a   : > { %1414 = vmatmul.mubr.msk.bf16.vlgmr.msra.gmra.mrb[0].mxu0 %vm1038_vm13, %v1583_v39 }
 0x1ed   : > { %v1415_v41 = vpop.f32.mrb[0].mxu0 }
 0x1ee   : > { %v1092_v42 = vadd.f32 %v1415_v41, %v1382_v40  ;;  %v1083_v43 = vpop.f32.mrb[1].mxu0 }
 0x1ef   : > { %v1084_v44 = vadd.f32 %v1382_v40, %v1083_v43  ;;  %v1416_v45 = vpop.f32.mrb[2].mxu0 }
 0x1f0   : > { %v1100_v46 = vadd.f32 3.0, %v1092_v42  ;;  %v1095_v47 = vadd.f32 %v1416_v45, %v1382_v40  ;;  %v1086_v48 = vpop.f32.mrb[3].mxu0 }
 0x1f1   : > { %v1098_v49 = vadd.f32 3.0, %v1084_v44  ;;  %v1087_v50 = vadd.f32 %v1382_v40, %v1086_v48 }
 0x1f2   : > { %v1104_v51 = vmax.f32 %v1100_v46, 0.0  ;;  %v1101_v52 = vadd.f32 3.0, %v1095_v47 }
 0x1f3   : > { %v1102_v53 = vmax.f32 %v1098_v49, 0.0  ;;  %v1099_v54 = vadd.f32 3.0, %v1087_v50 }
 0x1f4   : > { %v1108_v55 = vmin.f32 %v1104_v51, 6.0  ;;  %v1105_v56 = vmax.f32 %v1101_v52, 0.0 }
 0x1f5   : > { %v1106_v57 = vmin.f32 %v1102_v53, 6.0  ;;  %v1103_v58 = vmax.f32 %v1099_v54, 0.0 }
 0x1f6   : > { %v1112_v59 = vmul.f32 %v1108_v55, %v1092_v42  ;;  %v1109_v60 = vmin.f32 %v1105_v56, 6.0 }
 0x1f7   : > { %v1110_v61 = vmul.f32 %v1106_v57, %v1084_v44  ;;  %v1107_v62 = vmin.f32 %v1103_v58, 6.0 }
 0x1f8   : > { %v1116_v0 = vmul.f32 0.16666667, %v1112_v59  ;;  %v1113_v1 = vmul.f32 %v1109_v60, %v1095_v47 }
 0x1f9   : > { %v1114_v2 = vmul.f32 0.16666667, %v1110_v61  ;;  %v1111_v3 = vmul.f32 %v1107_v62, %v1087_v50 }
 0x1fa   : > { %1121 = vst.msk [vmem:[%s602_s20 + $0x10] sm:$0xff] %vm1118_vm14, %v1116_v0  ;;  %v1117_v4 = vmul.f32 0.16666667, %v1113_v1 }
 0x1fb   : > { %1119 = vst.msk [vmem:[%s602_s20] sm:$0xff] %vm1118_vm14, %v1114_v2  ;;  %v1115_v5 = vmul.f32 0.16666667, %v1111_v3 }
 0x1fc   : > { %1122 = vst.msk [vmem:[%s602_s20 + $0x18] sm:$0xff] %vm1118_vm14, %v1117_v4 }
 0x1fd   : > { %1120 = vst.msk [vmem:[%s602_s20 + $0x8] sm:$0xff] %vm1118_vm14, %v1115_v5 }
 0x1fe   : > { %1597 = shalt.err (!%p1594_p0)
}
 0x1ff   : > { %s1598_s27 = scalar_lea.hbm %s2132_s13, 512  ;;  %s1602_s29 = scalar_lea.hbm %s2202_s4, 2048 }
 0x200   : > { %p1599_p1 = scmp.ne.s32.totalorder %s2132_s13, %s1598_s27  ;;  %p1603_p4 = scmp.lt.u32.totalorder %s2132_s13, %s2202_s4 }
 0x201   : > { %p1604_p5 = scmp.lt.u32.totalorder %s1602_s29, %s1598_s27  ;;  %p1606_p7 = scmp.lt.u32.totalorder %s1598_s27, %s2132_s13 }
 0x202   : > { %p1600_p2 = pnand %p1599_p1, %p1880_p10 }
 0x203   : > { %p1605_p6 = por %p1604_p5, %p1603_p4 }
 0x204   : > { %p1601_p3 = pneg %p1600_p2 }
 0x205   : > { %p1607_p8 = por %p1606_p7, %p1605_p6 }
 0x207   : > { %p1608_p9 = pnand %p1607_p8, %p1601_p3 }
 0x209   : > { %1611 = shalt.err (!%p1608_p9)
}
 0x20a   : > { %s1758_s25 = smov 128  }
 0x20b   : > { %1419 = dma.vmem_to_hbm [thread:$0]  (%p1880_p10), %s2135_s21, 512, %s2132_s13, %s1124_s14, %s1758_s25, %s1758_s25, %s1750_s6  }
 0x20c PF: > { %p1425_p11 = scmp.ge.s32.totalorder %s1731_s24, 2  ;;  %s1154_s20 = sand.u32 1, %s1695_s15  }
 0x20d   : > { %s1155_s11 = scalar_lea.sflag [#allocation6], %s1154_s20 }
 0x20e   : > { %p1422_p12 = pnand %p1425_p11, %p1888_p13 }
 0x210   : > { %1686 = dma.done.wait (!%p1422_p12), %s1155_s11, 512  }
 0x211   : > { %1688 = vsyncadd (!%p1422_p12), %s1155_s11, 4294966784  ;;  %s17_s24 = sadd.s32 1, %s1731_s24   ;;  %s2226_s8 = sld [smem:[#allocation12_spill]] }
 0x212   : > { %p14_p0 = scmp.ge.s32.totalorder %s17_s24, 6   ;;  %s2227_s26 = sld [smem:[#allocation8_spill]] }
 0x213   : > { %s2228_s19 = sld [smem:[#allocation11_spill]]  ;;  %s2229_s6 = sld [smem:[#allocation9_spill]] }
 0x214   : > { %s2230_s12 = sld [smem:[#allocation10_spill]]  ;;  %s2231_s15 = smov %s1707_s18 }
 0x215   : > { %s2232_s16 = smov %s1703_s17  ;;  %s2235_s20 = smov %s1723_s22 }
 0x216   : > { %s2236_s21 = smov %s1727_s23  ;;  %16 = sbr.rel (!%p14_p0) target bundleno = 8 (0x8), region = 229 }
 0x217   : > { %s2233_s17 = smov %s2226_s8 }
 0x218   : > { %s2234_s18 = smov %s2227_s26 }
 0x219   : > { %s2237_s22 = smov %s2229_s6 }
 0x21a   : > { %s2238_s23 = smov %s2230_s12 }
 0x21d   :  { %1160 = vsyncpa [#allocation6], 1 }
 0x21e   :  { %1162 = vsyncpa [#allocation6 + $0x1], 1 }

</bundles_post_ra>
